<compile_context>
chip_gen: v5e
topology: v5e:2x2
jax: 0.10.0
libtpu: 0.0.40
codegen_flags: <defaults>
</compile_context>

<pallas_src>
import math
import functools

import jax
import jax.numpy as jnp
from jax.experimental import pallas as pl
from jax.experimental.pallas import tpu as pltpu


def _round_up(x, m):
    return ((x + m - 1) // m) * m


def _conv1d_kernel(x_ref, w_ref, b_ref, o_ref, xp_ref, *, K, dilation, padding, L_tile):
    # x_ref : (1, C_in, L)           f32  unpadded input, one batch element
    # w_ref : (C_out_t, K*C_in)      bf16 folded weight, w[o, t*C_in + i] = W[o, i, t]
    # b_ref : (C_out_t, 1)           f32  bias column
    # o_ref : (1, C_out_t, L_tile)   f32  output tile (L_tile % 128 == 0 -> lane dense)
    # xp_ref: (K*C_in, n_l*L_tile)   bf16 per-batch zero-padded im2col slab (scratch)
    co = pl.program_id(1)
    l = pl.program_id(2)
    c_in = x_ref.shape[1]
    L = x_ref.shape[2]
    width = xp_ref.shape[1]

    # Build the zero-padded, tap-shifted im2col slab once per batch element.
    # (b is the only "parallel" grid axis, so within a core every batch element
    #  is visited starting at co == 0, l == 0.)
    @pl.when(jnp.logical_and(co == 0, l == 0))
    def _():
        xb = x_ref[0].astype(jnp.bfloat16)               # (C_in, L) bf16, cast once
        for t in range(K):
            # Row block t must satisfy xp[t*C_in + i, j] = x_zeropad[i, j + t*dilation],
            # i.e. x[:, 0] lands at column (padding - t*dilation); clip at both ends.
            rows = slice(t * c_in, (t + 1) * c_in)
            dst = padding - t * dilation
            src = max(0, -dst)
            dst = max(0, dst)
            n = min(L - src, width - dst)
            if n <= 0:
                # Degenerate tap (huge dilation/padding): whole row block is padding.
                xp_ref[rows, :] = jnp.zeros((c_in, width), jnp.bfloat16)
            else:
                # Only memset the padding edges, copy the valid middle.
                if dst > 0:
                    xp_ref[rows, :dst] = jnp.zeros((c_in, dst), jnp.bfloat16)
                xp_ref[rows, dst:dst + n] = xb[:, src:src + n]
                if dst + n < width:
                    xp_ref[rows, dst + n:] = jnp.zeros((c_in, width - dst - n),
                                                       jnp.bfloat16)

    # One MXU matmul per output tile (taps + channels folded into the contraction).
    start = pl.multiple_of(l * L_tile, 128)
    slab = xp_ref[:, pl.ds(start, L_tile)]                       # (K*C_in, L_tile) bf16
    acc = jnp.dot(w_ref[...], slab, preferred_element_type=jnp.float32)
    o_ref[0] = (acc + b_ref[...]).astype(o_ref.dtype)


def conv_norm_forward(x, weight, bias, *, stride=1, padding=None, dilation=1):
    """Pallas implementation of ConvNorm.forward (Conv1d, NCL layout).

    x:      (B, C_in, L)      float32
    weight: (C_out, C_in, K)  float32
    bias:   (C_out,)          float32
    """
    B, C_in, L = x.shape
    C_out, C_in_w, K = weight.shape
    assert C_in == C_in_w
    assert stride == 1  # TODO(synk): strided conv not needed — ConvNorm in autovc uses stride=1
    if padding is None:
        assert K % 2 == 1
        padding = int(dilation * (K - 1) / 2)

    halo = dilation * (K - 1)
    L_out = L + 2 * padding - halo

    # Lane-dense output tiling: L_tile is a multiple of 128, output padded up and
    # sliced back to L_out at the end.
    L_tile = min(512, _round_up(L_out, 128))
    n_l = pl.cdiv(L_out, L_tile)
    L_pad_out = n_l * L_tile

    # Optional C_out tiling to keep each matmul/output tile modest.
    if C_out > 128 and C_out % 128 == 0:
        C_out_tile = 128
    else:
        C_out_tile = C_out
    n_co = C_out // C_out_tile

    # Parameters in kernel layout. (In a real model these would be stored this
    # way once, not re-folded per call.)
    w_folded = (jnp.transpose(weight, (0, 2, 1))          # (C_out, K, C_in)
                .reshape(C_out, K * C_in)
                .astype(jnp.bfloat16))
    b_col = bias.reshape(C_out, 1).astype(jnp.float32)

    kernel = functools.partial(_conv1d_kernel, K=K, dilation=dilation,
                               padding=padding, L_tile=L_tile)

    out_padded = pl.pallas_call(
        kernel,
        out_shape=jax.ShapeDtypeStruct((B, C_out, L_pad_out), x.dtype),
        grid=(B, n_co, n_l),
        in_specs=[
            pl.BlockSpec((1, C_in, L), lambda b, co, l: (b, 0, 0)),
            pl.BlockSpec((C_out_tile, K * C_in), lambda b, co, l: (co, 0)),
            pl.BlockSpec((C_out_tile, 1), lambda b, co, l: (co, 0)),
        ],
        out_specs=pl.BlockSpec((1, C_out_tile, L_tile), lambda b, co, l: (b, co, l)),
        scratch_shapes=[pltpu.VMEM((K * C_in, n_l * L_tile), jnp.bfloat16)],
        compiler_params=pltpu.CompilerParams(
            # Only the batch axis is core-parallel: the im2col scratch is built
            # at (co==0, l==0), so co/l must stay sequential within a core.
            dimension_semantics=("parallel", "arbitrary", "arbitrary"),
            # Above the 16/32 MiB scoped defaults, below v7x's 64 MiB physical.
            vmem_limit_bytes=48 * 1024 * 1024,
        ),
    )(x, w_folded, b_col)

    return out_padded[:, :, :L_out]


def init_conv_norm_params(key, in_channels, out_channels, kernel_size,
                          w_init_gain="linear"):
    """Deterministic xavier_uniform_ weight init (matches torch semantics)."""
    kw, kb = jax.random.split(key)
    fan_in = in_channels * kernel_size
    fan_out = out_channels * kernel_size
    gain = 1.0  # calculate_gain('linear') == 1.0
    bound = gain * math.sqrt(6.0 / (fan_in + fan_out))
    weight = jax.random.uniform(
        kw, (out_channels, in_channels, kernel_size),
        minval=-bound, maxval=bound, dtype=jnp.float32)
    # torch Conv1d default bias init: U(-1/sqrt(fan_in), 1/sqrt(fan_in))
    b_bound = 1.0 / math.sqrt(fan_in)
    bias = jax.random.uniform(
        kb, (out_channels,), minval=-b_bound, maxval=b_bound, dtype=jnp.float32)
    return weight, bias


if __name__ == "__main__":
    key = jax.random.PRNGKey(0)
    k_x, k_p = jax.random.split(key)

    B, C_in, L = 2, 8, 32
    C_out, K = 16, 5

    x = jax.random.normal(k_x, (B, C_in, L), dtype=jnp.float32)
    weight, bias = init_conv_norm_params(k_p, C_in, C_out, K)

    out = conv_norm_forward(x, weight, bias)
    out = jax.block_until_ready(out)
    assert out.shape == (B, C_out, L), out.shape

    # Reference: lax conv on the bf16-rounded operands with f32 accumulation
    # (exactly what the kernel computes: bf16 x bf16 -> f32).
    pad = (K - 1) // 2
    x_r = x.astype(jnp.bfloat16).astype(jnp.float32)
    w_r = weight.astype(jnp.bfloat16).astype(jnp.float32)
    ref = jax.lax.conv_general_dilated(
        x_r, w_r, window_strides=(1,), padding=[(pad, pad)],
        dimension_numbers=("NCH", "OIH", "NCH"),
        preferred_element_type=jnp.float32,
        precision=jax.lax.Precision.HIGHEST)
    ref = ref + bias.reshape(1, C_out, 1)

    assert jnp.allclose(out, ref, atol=1e-4, rtol=1e-4), "mismatch vs lax.conv reference"

    print("KERNEL_OK")
</pallas_src>

<mosaic_0001>
module attributes {stable_mosaic.version = 11 : i64} {
  func.func @_conv1d_kernel(%arg0: i32, %arg1: i32, %arg2: i32, %arg3: memref<1x8x32xf32, #tpu.memory_space<vmem>>, %arg4: memref<16x40xbf16, #tpu.memory_space<vmem>>, %arg5: memref<16x1xf32, #tpu.memory_space<vmem>>, %arg6: memref<1x16x128xf32, #tpu.memory_space<vmem>>, %arg7: memref<40x128xbf16, #tpu.memory_space<vmem>>) attributes {dimension_semantics = [#tpu.dimension_semantics<parallel>, #tpu.dimension_semantics<arbitrary>, #tpu.dimension_semantics<arbitrary>], iteration_bounds = array<i64: 2, 1, 1>, scalar_prefetch = 0 : i64, scratch_operands = 1 : i64, tpu.core_type = #tpu.core_type<tc>, window_params = [{transform_indices = @transform_0, window_bounds = array<i64: 1, 8, 32>}, {transform_indices = @transform_1, window_bounds = array<i64: 16, 40>}, {transform_indices = @transform_2, window_bounds = array<i64: 16, 1>}, {transform_indices = @transform_3, window_bounds = array<i64: 1, 16, 128>}]} {
    %c0_i32 = arith.constant 0 : i32
    %0 = arith.cmpi eq, %arg1, %c0_i32 : i32
    %c0_i32_0 = arith.constant 0 : i32
    %1 = arith.cmpi eq, %arg2, %c0_i32_0 : i32
    %2 = arith.andi %0, %1 : i1
    %3 = arith.extui %2 : i1 to i32
    %c0_i32_1 = arith.constant 0 : i32
    %4 = arith.cmpi ne, %3, %c0_i32_1 : i32
    scf.if %4 {
      %c0_9 = arith.constant 0 : index
      %c0_10 = arith.constant 0 : index
      %c0_11 = arith.constant 0 : index
      %17 = vector.load %arg3[%c0_9, %c0_10, %c0_11] : memref<1x8x32xf32, #tpu.memory_space<vmem>>, vector<1x8x32xf32>
      %18 = vector.shape_cast %17 : vector<1x8x32xf32> to vector<8x32xf32>
      %19 = arith.truncf %18 : vector<8x32xf32> to vector<8x32xbf16>
      %cst_12 = arith.constant 0.000000e+00 : bf16
      %20 = vector.broadcast %cst_12 : bf16 to vector<8x2xbf16>
      %c0_13 = arith.constant 0 : index
      %c0_14 = arith.constant 0 : index
      %21 = vector.load %arg7[%c0_13, %c0_14] : memref<40x128xbf16, #tpu.memory_space<vmem>>, vector<8x2xbf16>
      tpu.vector_store %arg7[%c0_13, %c0_14], %20 {strides = array<i32>} : memref<40x128xbf16, #tpu.memory_space<vmem>>, vector<8x2xbf16>,
      %c0_15 = arith.constant 0 : index
      %c2 = arith.constant 2 : index
      %22 = vector.load %arg7[%c0_15, %c2] : memref<40x128xbf16, #tpu.memory_space<vmem>>, vector<8x32xbf16>
      tpu.vector_store %arg7[%c0_15, %c2], %19 {strides = array<i32>} : memref<40x128xbf16, #tpu.memory_space<vmem>>, vector<8x32xbf16>,
      %cst_16 = arith.constant 0.000000e+00 : bf16
      %23 = vector.broadcast %cst_16 : bf16 to vector<8x94xbf16>
      %c0_17 = arith.constant 0 : index
      %c34 = arith.constant 34 : index
      %24 = vector.load %arg7[%c0_17, %c34] : memref<40x128xbf16, #tpu.memory_space<vmem>>, vector<8x94xbf16>
      tpu.vector_store %arg7[%c0_17, %c34], %23 {strides = array<i32>} : memref<40x128xbf16, #tpu.memory_space<vmem>>, vector<8x94xbf16>,
      %cst_18 = arith.constant 0.000000e+00 : bf16
      %25 = vector.broadcast %cst_18 : bf16 to vector<8x1xbf16>
      %c8 = arith.constant 8 : index
      %c0_19 = arith.constant 0 : index
      %26 = vector.load %arg7[%c8, %c0_19] : memref<40x128xbf16, #tpu.memory_space<vmem>>, vector<8x1xbf16>
      tpu.vector_store %arg7[%c8, %c0_19], %25 {strides = array<i32>} : memref<40x128xbf16, #tpu.memory_space<vmem>>, vector<8x1xbf16>,
      %c8_20 = arith.constant 8 : index
      %c1 = arith.constant 1 : index
      %27 = vector.load %arg7[%c8_20, %c1] : memref<40x128xbf16, #tpu.memory_space<vmem>>, vector<8x32xbf16>
      tpu.vector_store %arg7[%c8_20, %c1], %19 {strides = array<i32>} : memref<40x128xbf16, #tpu.memory_space<vmem>>, vector<8x32xbf16>,
      %cst_21 = arith.constant 0.000000e+00 : bf16
      %28 = vector.broadcast %cst_21 : bf16 to vector<8x95xbf16>
      %c8_22 = arith.constant 8 : index
      %c33 = arith.constant 33 : index
      %29 = vector.load %arg7[%c8_22, %c33] : memref<40x128xbf16, #tpu.memory_space<vmem>>, vector<8x95xbf16>
      tpu.vector_store %arg7[%c8_22, %c33], %28 {strides = array<i32>} : memref<40x128xbf16, #tpu.memory_space<vmem>>, vector<8x95xbf16>,
      %c16 = arith.constant 16 : index
      %c0_23 = arith.constant 0 : index
      %30 = vector.load %arg7[%c16, %c0_23] : memref<40x128xbf16, #tpu.memory_space<vmem>>, vector<8x32xbf16>
      tpu.vector_store %arg7[%c16, %c0_23], %19 {strides = array<i32>} : memref<40x128xbf16, #tpu.memory_space<vmem>>, vector<8x32xbf16>,
      %cst_24 = arith.constant 0.000000e+00 : bf16
      %31 = vector.broadcast %cst_24 : bf16 to vector<8x96xbf16>
      %c16_25 = arith.constant 16 : index
      %c32 = arith.constant 32 : index
      %32 = vector.load %arg7[%c16_25, %c32] : memref<40x128xbf16, #tpu.memory_space<vmem>>, vector<8x96xbf16>
      tpu.vector_store %arg7[%c16_25, %c32], %31 {strides = array<i32>} : memref<40x128xbf16, #tpu.memory_space<vmem>>, vector<8x96xbf16>,
      %33 = vector.extract_strided_slice %19 {offsets = [0, 1], sizes = [8, 31], strides = [1, 1]} : vector<8x32xbf16> to vector<8x31xbf16>
      %c24 = arith.constant 24 : index
      %c0_26 = arith.constant 0 : index
      %34 = vector.load %arg7[%c24, %c0_26] : memref<40x128xbf16, #tpu.memory_space<vmem>>, vector<8x31xbf16>
      tpu.vector_store %arg7[%c24, %c0_26], %33 {strides = array<i32>} : memref<40x128xbf16, #tpu.memory_space<vmem>>, vector<8x31xbf16>,
      %cst_27 = arith.constant 0.000000e+00 : bf16
      %35 = vector.broadcast %cst_27 : bf16 to vector<8x97xbf16>
      %c24_28 = arith.constant 24 : index
      %c31 = arith.constant 31 : index
      %36 = vector.load %arg7[%c24_28, %c31] : memref<40x128xbf16, #tpu.memory_space<vmem>>, vector<8x97xbf16>
      tpu.vector_store %arg7[%c24_28, %c31], %35 {strides = array<i32>} : memref<40x128xbf16, #tpu.memory_space<vmem>>, vector<8x97xbf16>,
      %37 = vector.extract_strided_slice %19 {offsets = [0, 2], sizes = [8, 30], strides = [1, 1]} : vector<8x32xbf16> to vector<8x30xbf16>
      %c32_29 = arith.constant 32 : index
      %c0_30 = arith.constant 0 : index
      %38 = vector.load %arg7[%c32_29, %c0_30] : memref<40x128xbf16, #tpu.memory_space<vmem>>, vector<8x30xbf16>
      tpu.vector_store %arg7[%c32_29, %c0_30], %37 {strides = array<i32>} : memref<40x128xbf16, #tpu.memory_space<vmem>>, vector<8x30xbf16>,
      %cst_31 = arith.constant 0.000000e+00 : bf16
      %39 = vector.broadcast %cst_31 : bf16 to vector<8x98xbf16>
      %c32_32 = arith.constant 32 : index
      %c30 = arith.constant 30 : index
      %40 = vector.load %arg7[%c32_32, %c30] : memref<40x128xbf16, #tpu.memory_space<vmem>>, vector<8x98xbf16>
      tpu.vector_store %arg7[%c32_32, %c30], %39 {strides = array<i32>} : memref<40x128xbf16, #tpu.memory_space<vmem>>, vector<8x98xbf16>,
    } else {
    }
    %c128_i32 = arith.constant 128 : i32
    %5 = arith.muli %arg2, %c128_i32 : i32
    %6 = tpu.assume_multiple %5, 128 : i32
    %c0 = arith.constant 0 : index
    %7 = arith.index_cast %6 : i32 to index
    %8 = vector.load %arg7[%c0, %7] : memref<40x128xbf16, #tpu.memory_space<vmem>>, vector<40x128xbf16>
    %c0_2 = arith.constant 0 : index
    %c0_3 = arith.constant 0 : index
    %9 = vector.load %arg4[%c0_2, %c0_3] : memref<16x40xbf16, #tpu.memory_space<vmem>>, vector<16x40xbf16>
    %cst = arith.constant dense<0.000000e+00> : vector<16x128xf32>
    %10 = tpu.matmul %9, %8, %cst {dimension_numbers = #tpu.dot_dimension_numbers<[1], [0], [0], [1], [0, 0, 1, 1], [], []>} : vector<16x40xbf16>, vector<40x128xbf16>, vector<16x128xf32> -> vector<16x128xf32>
    %c0_4 = arith.constant 0 : index
    %c0_5 = arith.constant 0 : index
    %11 = vector.load %arg5[%c0_4, %c0_5] : memref<16x1xf32, #tpu.memory_space<vmem>>, vector<16x1xf32>
    %12 = vector.broadcast %11 : vector<16x1xf32> to vector<16x128xf32>
    %13 = arith.addf %10, %12 : vector<16x128xf32>
    %c0_6 = arith.constant 0 : index
    %c0_7 = arith.constant 0 : index
    %c0_8 = arith.constant 0 : index
    %14 = vector.load %arg6[%c0_6, %c0_7, %c0_8] : memref<1x16x128xf32, #tpu.memory_space<vmem>>, vector<1x16x128xf32>
    %15 = vector.shape_cast %14 : vector<1x16x128xf32> to vector<16x128xf32>
    %16 = vector.shape_cast %13 : vector<16x128xf32> to vector<1x16x128xf32>
    tpu.vector_store %arg6[%c0_6, %c0_7, %c0_8], %16 {strides = array<i32>} : memref<1x16x128xf32, #tpu.memory_space<vmem>>, vector<1x16x128xf32>,
    return
  }
  func.func @transform_0(%arg0: i32, %arg1: i32, %arg2: i32) -> (i32, i32, i32) {
    %c0_i32 = arith.constant 0 : i32
    %c0_i32_0 = arith.constant 0 : i32
    %c0_i32_1 = arith.constant 0 : i32
    return %arg0, %c0_i32, %c0_i32_0 : i32, i32, i32
  }
  func.func @transform_1(%arg0: i32, %arg1: i32, %arg2: i32) -> (i32, i32) {
    %c0_i32 = arith.constant 0 : i32
    %c0_i32_0 = arith.constant 0 : i32
    return %arg1, %c0_i32 : i32, i32
  }
  func.func @transform_2(%arg0: i32, %arg1: i32, %arg2: i32) -> (i32, i32) {
    %c0_i32 = arith.constant 0 : i32
    %c0_i32_0 = arith.constant 0 : i32
    return %arg1, %c0_i32 : i32, i32
  }
  func.func @transform_3(%arg0: i32, %arg1: i32, %arg2: i32) -> (i32, i32, i32) {
    %c0_i32 = arith.constant 0 : i32
    return %arg0, %arg1, %arg2 : i32, i32, i32
  }
}

</mosaic_0001>

<bundles_post_ra>
// kernel: tpu_custom_call.1
= control target key start
LH: loop header
LB: loop body
LE: loop exit
PB: predicated region body
PF: predicated region fallthrough
CT: control target
= control target key end

     0   :  { %8 = vsyncpa [#allocation4], 0  ;;  %s838_s0 = inlined_call_operand.vmem [shape: f32[2,8,32], index: 0, kind: input, shape index: {}]   ;;  %s839_s1 = inlined_call_operand.hbm [shape: bf16[16,40], index: 1, kind: input, shape index: {}]   ;;  %s840_s2 = inlined_call_operand.vmem [shape: f32[16,1], index: 2, kind: input, shape index: {}]   ;;  %s841_s3 = inlined_call_operand.hbm [shape: f32[2,16,128], index: 3, kind: output, shape index: {}]  }
   0x1   :  { %9 = vsyncpa [#allocation5], 0 }
   0x2   :  { %11 = vsyncpa [#allocation5 + $0x1], 0  ;;  %s732_s12 = smov 0   ;;  %s734_s13 = smov 0  }
   0x3   :  { %s736_s14 = smov 0   ;;  %s738_s15 = smov 0  }
   0x4   :  { %s740_s16 = smov 0   ;;  %s742_s17 = smov 0  }
   0x5 LB: > { %s479_s18 = sadd.s32 4294967295, %s700_s17   ;;  %s480_s19 = sadd.s32 4294967294, %s700_s17   ;;  %s700_s17 = sphi %s742_s17, %s17_s17   ;;  %s696_s16 = sphi %s740_s16, %s848_s16   ;;  %s692_s15 = sphi %s738_s15, %s847_s15   ;;  %s688_s14 = sphi %s736_s14, %s846_s14   ;;  %s684_s13 = sphi %s734_s13, %s845_s13   ;;  %s680_s12 = sphi %s732_s12, %s844_s12  }
   0x6   : > { %s36_s20 = sadd.s32 1, %s696_s16  ;;  %s125_s21 = sadd.s32 1, %s688_s14 }
   0x7   : > { %p38_p0 = scmp.ge.s32.totalorder %s36_s20, 2  ;;  %p135_p1 = scmp.ne.s32.totalorder %s688_s14, %s684_s13 }
   0x8   : > { %p136_p2 = scmp.eq.s32.totalorder %s479_s18, 1  ;;  %p141_p3 = scmp.ne.s32.totalorder %s684_s13, %s680_s12 }
   0x9   : > { %s850_s20 = smov (%p38_p0, %s36_s20), 0  ;;  %p142_p5 = scmp.eq.s32.totalorder %s480_s19, 1 }
   0xa   : > { %p772_p4 = por %p136_p2, %p135_p1  ;;  %s118_s23 = ssub.s32 %s696_s16, %s850_s20 }
   0xb   : > { %p481_p6 = scmp.ge.s32.totalorder %s700_s17, 1  ;;  %p123_p7 = scmp.eq.s32.totalorder %s118_s23, 0 }
   0xc   : > { %p779_p8 = por %p142_p5, %p141_p3  ;;  %p149_p9 = scmp.lt.s32.totalorder %s700_s17, 3 }
   0xd   : > { %s785_s25 = scalar_select %p123_p7, %s688_s14, %s125_s21  }
   0xe   : > { %p150_p10 = pnand %p481_p6, %p149_p9  ;;  %p525_p11 = scmp.eq.s32.totalorder %s479_s18, 0 }
   0xf   : > { %s163_s28 = sshll.u32 %s839_s1, 4  ;;  %s702_s29 = smov [#allocation3]   ;;  %s164_s28 = int_to_ptr.hbm [resolvable:$true] %s163_s28 }
  0x10   : > { %p517_p12 = pneg %p150_p10  ;;  %s165_s30 = sshll.u32 %s702_s29, 4  ;;  %s166_s30 = int_to_ptr.vmem [resolvable:$true] %s165_s30 }
  0x11   : > { %s703_s4 = smov 64   ;;  %s704_s5 = smov 4  }
  0x12   : > { %p518_p13 = pnand %p525_p11, %p517_p12  ;;  %197 = sbr.rel (%p150_p10) target bundleno = 313 (0x139), region = 32 }
  0x14   : > { %520 = dma.hbm_to_vmem [thread:$0]  (!%p518_p13), %s164_s28, 128, %s166_s30, [#allocation4], %s703_s4, %s703_s4, %s704_s5  }
  0x17   : > { %671 = dma.done.wait (%p525_p11), [#allocation4], 128  }
  0x18   : > { %673 = vsyncadd (%p525_p11), [#allocation4], 4294967168  ;;  %p226_p0 = scmp.lt.s32.totalorder %s692_s15, 1  ;;  %v705_v0 = vmov 0   ;;  %vm266_vm0 = vcmask 257024   ;;  %s706_s11 = smov 126  }
  0x19   : > { %586 = vset.pattern.permute.xlu2 %v705_v0  ;;  %587 = vset.pattern.permute.xlu0 %v705_v0  ;;  %s707_s18 = smov 2   ;;  %s708_s19 = smov 127   ;;  %vm247_vm1 = vcmask 11264   ;;  %vm268_vm2 = vcmask 1043712   ;;  %vm257_vm3 = vcmask 3072   ;;  %v296_v3 = vld [vmem:[%s840_s2] sm:$0xff] }
  0x1a   : > { %s227_s6 = scalar_select %p226_p0, %s692_s15, 1  ;;  %248 = vst.msk [vmem:[#allocation2] sm:$0xf] %vm247_vm1, %v705_v0  ;;  %300 = vperm.xlu2 %586, %v296_v3   ;;  %vm280_vm4 = vcmask 240640   ;;  %vm282_vm5 = vcmask 1043696   ;;  %vm253_vm6 = vcmask 273424  }
  0x1b   : > { %s709_s21 = smov 1   ;;  %258 = vst.msk [vmem:[#allocation2 + $0x4] sm:$0xf] %vm257_vm3, %v705_v0  ;;  %v297_v6 = vld [vmem:[%s840_s2 + $0x8] sm:$0xff]  ;;  %vm255_vm7 = vcmask 1043728   ;;  %vm273_vm8 = vcmask 248832  }
  0x1c   : > { %s488_s7 = sshll.u32 %s227_s6, 3  ;;  %vm275_vm9 = vcmask 1043704   ;;  %vm262_vm10 = vcmask 265224   ;;  %vm264_vm11 = vcmask 1043720   ;;  %vm332_vm12 = vcmask 1043456   ;;  %v509_v15 = vld [vmem:[#allocation3] sm:$0xff] }
  0x1d   : > { %s229_s10 = scalar_lea.vmem %s838_s0, %s488_s7  ;;  %vm328_vm13 = vcmask 326656   ;;  %s223_s29 = sand.u32 1, %s684_s13  }
  0x1e   : > { %v245_v1 = vld [vmem:[%s229_s10] sm:$0xff]  ;;  %s487_s30 = sshll.u32 %s223_s29, 4  ;;  %s510_s4 = sshll.u32 %s692_s15, 4 }
  0x1f   : > { %v246_v2 = vpack.c.bf16 %v245_v1, %v245_v1  ;;  %s367_s7 = scalar_lea.hbm %s841_s3, %s510_s4  ;;  %s225_s8 = scalar_lea.vmem [#allocation6], %s487_s30 }
  0x20   : > { %s368_s9 = sshll.u32 %s225_s8, 4  ;;  %s370_s10 = sshll.u32 %s367_s7, 4  ;;  %s369_s9 = int_to_ptr.vmem [resolvable:$true] %s368_s9  ;;  %s371_s10 = int_to_ptr.hbm [resolvable:$true] %s370_s10 }
  0x21   : > { %277 = vrot.lane.b32.xlu0 %v246_v2, %s706_s11  ;;  %267 = vst.msk [vmem:[#allocation2 + $0x8] sm:$0xf] %vm266_vm0, %v246_v2  ;;  %250 = vrot.lane.b32.xlu1 %v246_v2, %s707_s18  ;;  %s353_s11 = scalar_lea.sflag [#allocation5], %s223_s29  ;;  %s632_s18 = sshra.s32 %s371_s10, 4  ;;  %s633_s18 = int_to_ptr.hbm [resolvable:$true] %s632_s18 }
  0x22   : > { %269 = vst.msk [vmem:[#allocation2 + $0x8] sm:$0xf] %vm268_vm2, %v705_v0  ;;  %305 = vperm.xlu2 %586, %v297_v6   ;;  %s634_s15 = scalar_lea.hbm %s633_s18, 16  ;;  %s638_s23 = scalar_lea.hbm %s841_s3, 32 }
  0x23   : > { %p635_p1 = scmp.ne.s32.totalorder %s633_s18, %s634_s15  ;;  %p639_p5 = scmp.lt.s32.totalorder %s633_s18, %s841_s3 }
  0x24   : > { %p640_p6 = scmp.lt.s32.totalorder %s638_s23, %s634_s15 }
  0x25   : > { %p636_p2 = pnand %p635_p1, %p772_p4 }
  0x26   : > { %p641_p7 = por %p640_p6, %p639_p5 }
  0x27   : > { %p637_p3 = pneg %p636_p2 }
  0x29   : > { %270 = vrot.lane.b32.xlu0 %v246_v2, %s708_s19  ;;  %259 = vrot.lane.b32.xlu1 %v246_v2, %s709_s21  ;;  %p642_p9 = pnand %p641_p7, %p637_p3 }
  0x74   : > { %v301_v16 = vpop.permute.xlu2 %300 }
  0x7c   : > { %v306_v19 = vpop.permute.xlu2 %305 }
  0x93   : > { %v278_v4 = vpop.permute.xlu0 %277  ;;  %v251_v5 = vpop.permute.xlu1 %250 }
  0x94   : > { %281 = vst.msk [vmem:[#allocation2 + $0x10] sm:$0xf] %vm280_vm4, %v278_v4 }
  0x95   : > { %283 = vst.msk [vmem:[#allocation2 + $0x10] sm:$0xf] %vm282_vm5, %v705_v0 }
  0x96   : > { %254 = vst.msk [vmem:[#allocation2] sm:$0xf] %vm253_vm6, %v251_v5 }
  0x97   : > { %256 = vst.msk [vmem:[#allocation2] sm:$0xf] %vm255_vm7, %v705_v0 }
  0x9b   : > { %v271_v7 = vpop.permute.xlu0 %270  ;;  %v260_v8 = vpop.permute.xlu1 %259 }
  0x9c   : > { %274 = vst.msk [vmem:[#allocation2 + $0xc] sm:$0xf] %vm273_vm8, %v271_v7  ;;  %v293_v9 = vld [vmem:[#allocation2 + $0x10] sm:$0xf] }
  0x9d   : > { %276 = vst.msk [vmem:[#allocation2 + $0xc] sm:$0xf] %vm275_vm9, %v705_v0  ;;  %v322_v10 = vunpack.c.l.b16 %v293_v9 }
  0x9e   : > { %263 = vst.msk [vmem:[#allocation2 + $0x4] sm:$0xf] %vm262_vm10, %v260_v8 }
  0x9f   : > { %265 = vst.msk [vmem:[#allocation2 + $0x4] sm:$0xf] %vm264_vm11, %v705_v0  ;;  %v325_v11 = vpack.c.b16 %v322_v10, %v322_v10 }
  0xa1   : > { %v334_v12 = vsel %vm332_vm12, %v325_v11, 0 }
  0xa2   : > { %341 = vmatpush.bf16.msra.mxu0 %v334_v12 }
  0xa4   : > { %v508_v13 = vld [vmem:[#allocation2 + $0x8] sm:$0xff] }
  0xa6   : > { %342 = vmatpush.bf16.msra.mxu0 %v508_v13  ;;  %v507_v14 = vld [vmem:[#allocation2] sm:$0xff] }
  0xaa   : > { %343 = vmatpush.bf16.msra.mxu0 %v507_v14 }
  0xad   : > { %501 = vmatmul.msk.bf16.vlgmr.msra.gmra.mxu0 %vm328_vm13, %v509_v15 }
 0x12a   : > { %v345_v17 = vpop.f32.mrf.mxu0 }
 0x12b   : > { %v346_v18 = vadd.f32 %v345_v17, %v301_v16 }
 0x12d   : > { %350 = vst [vmem:[%s225_s8] sm:$0xff] %v346_v18 }
 0x132   : > { %v347_v20 = vpop.f32.mrf.mxu0 }
 0x133   : > { %v348_v21 = vadd.f32 %v347_v20, %v306_v19 }
 0x135   : > { %351 = vst [vmem:[%s225_s8 + $0x8] sm:$0xff] %v348_v21 }
 0x136   : > { %645 = shalt.err (!%p642_p9)
}
 0x137   : > { %s710_s28 = smov 128   ;;  %s711_s29 = smov 8  }
 0x138   : > { %515 = dma.vmem_to_hbm [thread:$0]  (%p772_p4), %s369_s9, 256, %s371_s10, %s353_s11, %s710_s28, %s710_s28, %s711_s29  }
 0x139 PF: > { %p527_p10 = scmp.ge.s32.totalorder %s700_s17, 2  ;;  %s385_s30 = sand.u32 1, %s680_s12  }
 0x13a   : > { %s386_s4 = scalar_lea.sflag [#allocation5], %s385_s30 }
 0x13b   : > { %p522_p11 = pnand %p527_p10, %p779_p8 }
 0x13d   : > { %p523_p12 = pneg %p522_p11 }
 0x13f   : > { %675 = dma.done.wait (%p523_p12), %s386_s4, 256  }
 0x140   : > { %677 = vsyncadd (%p523_p12), %s386_s4, 4294967040  ;;  %s17_s17 = sadd.s32 1, %s700_s17   ;;  %s844_s12 = smov %s684_s13 }
 0x141   : > { %p14_p13 = scmp.ge.s32.totalorder %s17_s17, 4   ;;  %s845_s13 = smov %s688_s14 }
 0x142   : > { %s846_s14 = smov %s785_s25  ;;  %s847_s15 = smov %s696_s16 }
 0x143   : > { %s848_s16 = smov %s850_s20  ;;  %16 = sbr.rel (!%p14_p13) target bundleno = 5 (0x5), region = 81 }
 0x148   :  { %392 = vsyncpa [#allocation4], 1 }
 0x149   :  { %394 = vsyncpa [#allocation4 + $0x1], 1 }
 0x14a   :  { %395 = vsyncpa [#allocation5], 1 }
 0x14b   :  { %397 = vsyncpa [#allocation5 + $0x1], 1 }

</bundles_post_ra>
